<compile_context>
chip_gen: v7x
topology: tpu7x:2x2x1
jax: 0.10.0
libtpu: 0.0.40
codegen_flags: <defaults>
</compile_context>

<pallas_src>
import functools
import numpy as np
import jax
import jax.numpy as jnp
from jax.experimental import pallas as pl
from jax.experimental.pallas import tpu as pltpu

N_QUBITS = 4
N_QUANTUM_LAYERS = 15
Q_DEPTH = 6
Q_DELTA = 0.01
DIM = 2 ** N_QUBITS  # 16

# Batch tile: multiple of 256 (MXU stream width on v6e/v7x). With bf16 x tiles
# this is 1 MiB per buffer -> comfortably inside v7x's 64 MiB VMEM even when
# double-buffered.
DEFAULT_BATCH_TILE = 1024


# ---------------------------------------------------------------------------
# Parameter-setup glue (plain numpy): fixed 16x16 circuit unitary, PauliZ
# signs folded with the post-linear weight, and bit-float table for state prep.
# Wire 0 is the most-significant bit.
# ---------------------------------------------------------------------------
def _ry_2x2(theta):
    c, s = np.cos(theta / 2.0), np.sin(theta / 2.0)
    return np.array([[c, -s], [s, c]], dtype=np.float64)


def _ry_layer_full(angles):
    mats = [_ry_2x2(a) for a in angles]
    return functools.reduce(np.kron, mats)


def _cnot_full(control, target):
    m = np.zeros((DIM, DIM), dtype=np.float64)
    for i in range(DIM):
        bit_c = (i >> (N_QUBITS - 1 - control)) & 1
        j = i
        if bit_c == 1:
            j = i ^ (1 << (N_QUBITS - 1 - target))
        m[j, i] = 1.0
    return m


def _entangling_layer_full():
    u = np.eye(DIM, dtype=np.float64)
    for i in range(0, N_QUBITS - 1, 2):       # CNOT(0,1), CNOT(2,3)
        u = _cnot_full(i, i + 1) @ u
    for i in range(1, N_QUBITS - 1, 2):       # CNOT(1,2)
        u = _cnot_full(i, i + 1) @ u
    return u


def build_fixed_unitary(q_params_flat):
    """U_fixed = prod_k [ RY(q_weights[k+1]) @ Entangler ],  k = 0..Q_DEPTH-1."""
    qw = np.asarray(q_params_flat, dtype=np.float64).reshape(
        N_QUANTUM_LAYERS, N_QUBITS)
    ent = _entangling_layer_full()
    u = np.eye(DIM, dtype=np.float64)
    for k in range(Q_DEPTH):
        u = _ry_layer_full(qw[k + 1]) @ ent @ u
    return u


def build_z_sign():
    z = np.zeros((DIM, N_QUBITS), dtype=np.float64)
    for i in range(DIM):
        for j in range(N_QUBITS):
            bit = (i >> (N_QUBITS - 1 - j)) & 1
            z[i, j] = 1.0 if bit == 0 else -1.0
    return z


def build_bit_table():
    """bitf[j, i] = j-th (MSB-first) bit of basis index i, as float."""
    b = np.zeros((N_QUBITS, DIM), dtype=np.float32)
    for j in range(N_QUBITS):
        for i in range(DIM):
            b[j, i] = float((i >> (N_QUBITS - 1 - j)) & 1)
    return b


# ---------------------------------------------------------------------------
# Pallas kernel: one batch tile per grid step.
# ---------------------------------------------------------------------------
def quantumnet_kernel(x_ref, wpre_ref, bpre_ref, bitf_ref, ufixT_ref,
                      zw_ref, bpost_ref, out_ref):
    # pre_net: Linear(512 -> 4), bf16 operands, f32 MXU accumulation.
    pre = jnp.dot(x_ref[...], wpre_ref[...],
                  preferred_element_type=jnp.float32) + bpre_ref[...]   # (TB, 4)

    # q_in = tanh(pre) * pi/2.  RY(q_in) on the Hadamard state gives per-qubit
    # amplitudes amp0 = cos(q_in/2 + pi/4), amp1 = sin(q_in/2 + pi/4).
    phase = jnp.tanh(pre) * jnp.float32(np.pi / 4.0) + jnp.float32(np.pi / 4.0)
    amp0 = jnp.cos(phase)                                               # (TB, 4)
    amp1 = jnp.sin(phase)
    diff = amp1 - amp0

    # 16-dim state = Kronecker product over qubits, built with 0/1 bit floats
    # (no iota / shifts / compares): amp(bit) = amp0 + (amp1 - amp0) * bit.
    bitf = bitf_ref[...]                                                # (4, 16)
    tb = x_ref.shape[0]
    state = jnp.ones((tb, DIM), jnp.float32)
    for j in range(N_QUBITS):
        state = state * (amp0[:, j:j + 1] + diff[:, j:j + 1] * bitf[j:j + 1, :])

    # Apply the fixed (parameter-only) circuit unitary:  psi = state @ U^T
    psi = jnp.dot(state, ufixT_ref[...],
                  preferred_element_type=jnp.float32)                   # (TB, 16)

    # out = (psi^2 @ (z_sign @ w_post)) + b_post   (z_sign@w_post pre-folded)
    probs = psi * psi
    out_ref[...] = jnp.dot(probs, zw_ref[...],
                           preferred_element_type=jnp.float32) + bpost_ref[...]


def quantumnet_forward(x, params, *, batch_tile=DEFAULT_BATCH_TILE):
    B, F = x.shape
    tb = min(batch_tile, B)
    grid = (pl.cdiv(B, tb),)

    # bf16 only for the HBM-heavy x and the stationary pre-weight; everything
    # else stays f32.
    x_bf16 = x.astype(jnp.bfloat16)
    w_pre_bf16 = params["w_pre"].astype(jnp.bfloat16)

    def full_spec(arr):
        shape = arr.shape
        return pl.BlockSpec(shape, lambda i: (0,) * len(shape))

    return pl.pallas_call(
        quantumnet_kernel,
        out_shape=jax.ShapeDtypeStruct((B, 2), jnp.float32),
        grid=grid,
        in_specs=[
            pl.BlockSpec((tb, F), lambda i: (i, 0)),      # x: streamed per tile
            full_spec(w_pre_bf16),                        # (512, 4)
            full_spec(params["b_pre"]),                   # (1, 4)
            full_spec(params["bitf"]),                    # (4, 16)
            full_spec(params["u_fixed_T"]),               # (16, 16)
            full_spec(params["zw"]),                      # (16, 2)
            full_spec(params["b_post"]),                  # (1, 2)
        ],
        out_specs=pl.BlockSpec((tb, 2), lambda i: (i, 0)),
        compiler_params=pltpu.CompilerParams(
            dimension_semantics=("parallel",)),
    )(x_bf16, w_pre_bf16, params["b_pre"], params["bitf"],
      params["u_fixed_T"], params["zw"], params["b_post"])


# ---------------------------------------------------------------------------
# Pure-JAX f32 reference (correctness check only; kernel uses bf16 for the
# 512-contraction, so the comparison tolerance is loosened accordingly).
# ---------------------------------------------------------------------------
def quantumnet_reference(x, params):
    pre = x @ params["w_pre"] + params["b_pre"]
    q_in = jnp.tanh(pre) * (jnp.pi / 2.0)
    half = q_in * 0.5
    c, s = jnp.cos(half), jnp.sin(half)
    inv_sqrt2 = 1.0 / np.sqrt(2.0)
    amp0 = (c - s) * inv_sqrt2
    amp1 = (c + s) * inv_sqrt2
    basis = np.arange(DIM)
    state = jnp.ones((x.shape[0], DIM), jnp.float32)
    for j in range(N_QUBITS):
        bit = (basis >> (N_QUBITS - 1 - j)) & 1
        state = state * jnp.where(bit[None, :] == 0,
                                  amp0[:, j:j + 1], amp1[:, j:j + 1])
    psi = state @ params["u_fixed_T"]
    zexp = (psi * psi) @ params["z_sign"]
    return zexp @ params["w_post"] + params["b_post"]


# ---------------------------------------------------------------------------
if __name__ == "__main__":
    key = jax.random.PRNGKey(0)
    k_x, k_wpre, k_bpre, k_q, k_wpost, k_bpost = jax.random.split(key, 6)

    B = 8
    IN_FEATURES = 512  # fixed by nn.Linear(512, n_qubits)

    x = jax.random.normal(k_x, (B, IN_FEATURES), dtype=jnp.float32)

    # Deterministic synthetic parameters (PyTorch-style uniform init bounds).
    bound_pre = 1.0 / np.sqrt(IN_FEATURES)
    w_pre = jax.random.uniform(k_wpre, (IN_FEATURES, N_QUBITS),
                               minval=-bound_pre, maxval=bound_pre,
                               dtype=jnp.float32)
    b_pre = jax.random.uniform(k_bpre, (1, N_QUBITS),
                               minval=-bound_pre, maxval=bound_pre,
                               dtype=jnp.float32)

    q_params = Q_DELTA * jax.random.normal(
        k_q, (N_QUANTUM_LAYERS * N_QUBITS,), dtype=jnp.float32)

    bound_post = 1.0 / np.sqrt(N_QUBITS)
    w_post = jax.random.uniform(k_wpost, (N_QUBITS, 2),
                                minval=-bound_post, maxval=bound_post,
                                dtype=jnp.float32)
    b_post = jax.random.uniform(k_bpost, (1, 2),
                                minval=-bound_post, maxval=bound_post,
                                dtype=jnp.float32)

    u_fixed = build_fixed_unitary(np.asarray(q_params))
    z_sign = build_z_sign()
    zw = z_sign @ np.asarray(w_post, dtype=np.float64)   # fold PauliZ signs + post weight

    params = dict(
        w_pre=w_pre,
        b_pre=b_pre,
        u_fixed_T=jnp.asarray(u_fixed.T, dtype=jnp.float32),
        z_sign=jnp.asarray(z_sign, dtype=jnp.float32),
        bitf=jnp.asarray(build_bit_table(), dtype=jnp.float32),
        zw=jnp.asarray(zw, dtype=jnp.float32),
        w_post=w_post,
        b_post=b_post,
    )

    out = quantumnet_forward(x, params)
    out = jax.block_until_ready(out)

    ref = jax.block_until_ready(quantumnet_reference(x, params))
    assert out.shape == (B, 2)
    # Tolerance loosened vs. the pure-f32 reference because the 512-contraction
    # pre-matmul runs with bf16 operands (f32 accumulation) inside the kernel.
    np.testing.assert_allclose(np.asarray(out), np.asarray(ref),
                               rtol=5e-2, atol=5e-2)

    print("KERNEL_OK")
</pallas_src>

<mosaic_0001>
module attributes {stable_mosaic.version = 11 : i64} {
  func.func @quantumnet_kernel(%arg0: i32, %arg1: memref<8x512xbf16, #tpu.memory_space<vmem>>, %arg2: memref<512x4xbf16, #tpu.memory_space<vmem>>, %arg3: memref<1x4xf32, #tpu.memory_space<vmem>>, %arg4: memref<4x16xf32, #tpu.memory_space<vmem>>, %arg5: memref<16x16xf32, #tpu.memory_space<vmem>>, %arg6: memref<16x2xf32, #tpu.memory_space<vmem>>, %arg7: memref<1x2xf32, #tpu.memory_space<vmem>>, %arg8: memref<8x2xf32, #tpu.memory_space<vmem>>) attributes {dimension_semantics = [#tpu.dimension_semantics<parallel>], iteration_bounds = array<i64: 1>, scalar_prefetch = 0 : i64, scratch_operands = 0 : i64, tpu.core_type = #tpu.core_type<tc>, window_params = [{transform_indices = @transform_0, window_bounds = array<i64: 8, 512>}, {pipeline_mode = #tpu.pipeline_mode<synchronous>, transform_indices = @transform_1, window_bounds = array<i64: 512, 4>}, {pipeline_mode = #tpu.pipeline_mode<synchronous>, transform_indices = @transform_2, window_bounds = array<i64: 1, 4>}, {pipeline_mode = #tpu.pipeline_mode<synchronous>, transform_indices = @transform_3, window_bounds = array<i64: 4, 16>}, {pipeline_mode = #tpu.pipeline_mode<synchronous>, transform_indices = @transform_4, window_bounds = array<i64: 16, 16>}, {pipeline_mode = #tpu.pipeline_mode<synchronous>, transform_indices = @transform_5, window_bounds = array<i64: 16, 2>}, {pipeline_mode = #tpu.pipeline_mode<synchronous>, transform_indices = @transform_6, window_bounds = array<i64: 1, 2>}, {transform_indices = @transform_7, window_bounds = array<i64: 8, 2>}]} {
    %c0 = arith.constant 0 : index
    %c0_0 = arith.constant 0 : index
    %0 = vector.load %arg1[%c0, %c0_0] : memref<8x512xbf16, #tpu.memory_space<vmem>>, vector<8x512xbf16>
    %c0_1 = arith.constant 0 : index
    %c0_2 = arith.constant 0 : index
    %1 = vector.load %arg2[%c0_1, %c0_2] : memref<512x4xbf16, #tpu.memory_space<vmem>>, vector<512x4xbf16>
    %cst = arith.constant dense<0.000000e+00> : vector<8x4xf32>
    %2 = tpu.matmul %0, %1, %cst {dimension_numbers = #tpu.dot_dimension_numbers<[1], [0], [0], [1], [0, 0, 1, 1], [], []>} : vector<8x512xbf16>, vector<512x4xbf16>, vector<8x4xf32> -> vector<8x4xf32>
    %c0_3 = arith.constant 0 : index
    %c0_4 = arith.constant 0 : index
    %3 = vector.load %arg3[%c0_3, %c0_4] : memref<1x4xf32, #tpu.memory_space<vmem>>, vector<1x4xf32>
    %4 = vector.broadcast %3 : vector<1x4xf32> to vector<8x4xf32>
    %5 = arith.addf %2, %4 : vector<8x4xf32>
    %6 = math.tanh %5 : vector<8x4xf32>
    %cst_5 = arith.constant 0.785398185 : f32
    %7 = vector.broadcast %cst_5 : f32 to vector<8x4xf32>
    %8 = arith.mulf %6, %7 : vector<8x4xf32>
    %cst_6 = arith.constant 0.785398185 : f32
    %9 = vector.broadcast %cst_6 : f32 to vector<8x4xf32>
    %10 = arith.addf %8, %9 : vector<8x4xf32>
    %11 = math.cos %10 : vector<8x4xf32>
    %12 = math.sin %10 : vector<8x4xf32>
    %13 = arith.subf %12, %11 : vector<8x4xf32>
    %c0_7 = arith.constant 0 : index
    %c0_8 = arith.constant 0 : index
    %14 = vector.load %arg4[%c0_7, %c0_8] : memref<4x16xf32, #tpu.memory_space<vmem>>, vector<4x16xf32>
    %cst_9 = arith.constant 1.000000e+00 : f32
    %15 = vector.broadcast %cst_9 : f32 to vector<8x16xf32>
    %16 = vector.extract_strided_slice %11 {offsets = [0, 0], sizes = [8, 1], strides = [1, 1]} : vector<8x4xf32> to vector<8x1xf32>
    %17 = vector.extract_strided_slice %13 {offsets = [0, 0], sizes = [8, 1], strides = [1, 1]} : vector<8x4xf32> to vector<8x1xf32>
    %18 = vector.extract_strided_slice %14 {offsets = [0, 0], sizes = [1, 16], strides = [1, 1]} : vector<4x16xf32> to vector<1x16xf32>
    %19 = vector.broadcast %17 : vector<8x1xf32> to vector<8x16xf32>
    %20 = vector.broadcast %18 : vector<1x16xf32> to vector<8x16xf32>
    %21 = arith.mulf %19, %20 : vector<8x16xf32>
    %22 = vector.broadcast %16 : vector<8x1xf32> to vector<8x16xf32>
    %23 = arith.addf %22, %21 : vector<8x16xf32>
    %24 = arith.mulf %15, %23 : vector<8x16xf32>
    %25 = vector.extract_strided_slice %11 {offsets = [0, 1], sizes = [8, 1], strides = [1, 1]} : vector<8x4xf32> to vector<8x1xf32>
    %26 = vector.extract_strided_slice %13 {offsets = [0, 1], sizes = [8, 1], strides = [1, 1]} : vector<8x4xf32> to vector<8x1xf32>
    %27 = vector.extract_strided_slice %14 {offsets = [1, 0], sizes = [1, 16], strides = [1, 1]} : vector<4x16xf32> to vector<1x16xf32>
    %28 = vector.broadcast %26 : vector<8x1xf32> to vector<8x16xf32>
    %29 = vector.broadcast %27 : vector<1x16xf32> to vector<8x16xf32>
    %30 = arith.mulf %28, %29 : vector<8x16xf32>
    %31 = vector.broadcast %25 : vector<8x1xf32> to vector<8x16xf32>
    %32 = arith.addf %31, %30 : vector<8x16xf32>
    %33 = arith.mulf %24, %32 : vector<8x16xf32>
    %34 = vector.extract_strided_slice %11 {offsets = [0, 2], sizes = [8, 1], strides = [1, 1]} : vector<8x4xf32> to vector<8x1xf32>
    %35 = vector.extract_strided_slice %13 {offsets = [0, 2], sizes = [8, 1], strides = [1, 1]} : vector<8x4xf32> to vector<8x1xf32>
    %36 = vector.extract_strided_slice %14 {offsets = [2, 0], sizes = [1, 16], strides = [1, 1]} : vector<4x16xf32> to vector<1x16xf32>
    %37 = vector.broadcast %35 : vector<8x1xf32> to vector<8x16xf32>
    %38 = vector.broadcast %36 : vector<1x16xf32> to vector<8x16xf32>
    %39 = arith.mulf %37, %38 : vector<8x16xf32>
    %40 = vector.broadcast %34 : vector<8x1xf32> to vector<8x16xf32>
    %41 = arith.addf %40, %39 : vector<8x16xf32>
    %42 = arith.mulf %33, %41 : vector<8x16xf32>
    %43 = vector.extract_strided_slice %11 {offsets = [0, 3], sizes = [8, 1], strides = [1, 1]} : vector<8x4xf32> to vector<8x1xf32>
    %44 = vector.extract_strided_slice %13 {offsets = [0, 3], sizes = [8, 1], strides = [1, 1]} : vector<8x4xf32> to vector<8x1xf32>
    %45 = vector.extract_strided_slice %14 {offsets = [3, 0], sizes = [1, 16], strides = [1, 1]} : vector<4x16xf32> to vector<1x16xf32>
    %46 = vector.broadcast %44 : vector<8x1xf32> to vector<8x16xf32>
    %47 = vector.broadcast %45 : vector<1x16xf32> to vector<8x16xf32>
    %48 = arith.mulf %46, %47 : vector<8x16xf32>
    %49 = vector.broadcast %43 : vector<8x1xf32> to vector<8x16xf32>
    %50 = arith.addf %49, %48 : vector<8x16xf32>
    %51 = arith.mulf %42, %50 : vector<8x16xf32>
    %c0_10 = arith.constant 0 : index
    %c0_11 = arith.constant 0 : index
    %52 = vector.load %arg5[%c0_10, %c0_11] : memref<16x16xf32, #tpu.memory_space<vmem>>, vector<16x16xf32>
    %cst_12 = arith.constant dense<0.000000e+00> : vector<8x16xf32>
    %53 = tpu.matmul %51, %52, %cst_12 {dimension_numbers = #tpu.dot_dimension_numbers<[1], [0], [0], [1], [0, 0, 1, 1], [], []>} : vector<8x16xf32>, vector<16x16xf32>, vector<8x16xf32> -> vector<8x16xf32>
    %54 = arith.mulf %53, %53 : vector<8x16xf32>
    %c0_13 = arith.constant 0 : index
    %c0_14 = arith.constant 0 : index
    %55 = vector.load %arg6[%c0_13, %c0_14] : memref<16x2xf32, #tpu.memory_space<vmem>>, vector<16x2xf32>
    %cst_15 = arith.constant dense<0.000000e+00> : vector<8x2xf32>
    %56 = tpu.matmul %54, %55, %cst_15 {dimension_numbers = #tpu.dot_dimension_numbers<[1], [0], [0], [1], [0, 0, 1, 1], [], []>} : vector<8x16xf32>, vector<16x2xf32>, vector<8x2xf32> -> vector<8x2xf32>
    %c0_16 = arith.constant 0 : index
    %c0_17 = arith.constant 0 : index
    %57 = vector.load %arg7[%c0_16, %c0_17] : memref<1x2xf32, #tpu.memory_space<vmem>>, vector<1x2xf32>
    %58 = vector.broadcast %57 : vector<1x2xf32> to vector<8x2xf32>
    %59 = arith.addf %56, %58 : vector<8x2xf32>
    %c0_18 = arith.constant 0 : index
    %c0_19 = arith.constant 0 : index
    %60 = vector.load %arg8[%c0_18, %c0_19] : memref<8x2xf32, #tpu.memory_space<vmem>>, vector<8x2xf32>
    tpu.vector_store %arg8[%c0_18, %c0_19], %59 {strides = array<i32>} : memref<8x2xf32, #tpu.memory_space<vmem>>, vector<8x2xf32>,
    return
  }
  func.func @transform_0(%arg0: i32) -> (i32, i32) {
    %c0_i32 = arith.constant 0 : i32
    %c0_i32_0 = arith.constant 0 : i32
    return %arg0, %c0_i32 : i32, i32
  }
  func.func @transform_1(%arg0: i32) -> (i32, i32) {
    %c0_i32 = arith.constant 0 : i32
    %c0_i32_0 = arith.constant 0 : i32
    %c0_i32_1 = arith.constant 0 : i32
    return %c0_i32, %c0_i32_0 : i32, i32
  }
  func.func @transform_2(%arg0: i32) -> (i32, i32) {
    %c0_i32 = arith.constant 0 : i32
    %c0_i32_0 = arith.constant 0 : i32
    %c0_i32_1 = arith.constant 0 : i32
    return %c0_i32, %c0_i32_0 : i32, i32
  }
  func.func @transform_3(%arg0: i32) -> (i32, i32) {
    %c0_i32 = arith.constant 0 : i32
    %c0_i32_0 = arith.constant 0 : i32
    %c0_i32_1 = arith.constant 0 : i32
    return %c0_i32, %c0_i32_0 : i32, i32
  }
  func.func @transform_4(%arg0: i32) -> (i32, i32) {
    %c0_i32 = arith.constant 0 : i32
    %c0_i32_0 = arith.constant 0 : i32
    %c0_i32_1 = arith.constant 0 : i32
    return %c0_i32, %c0_i32_0 : i32, i32
  }
  func.func @transform_5(%arg0: i32) -> (i32, i32) {
    %c0_i32 = arith.constant 0 : i32
    %c0_i32_0 = arith.constant 0 : i32
    %c0_i32_1 = arith.constant 0 : i32
    return %c0_i32, %c0_i32_0 : i32, i32
  }
  func.func @transform_6(%arg0: i32) -> (i32, i32) {
    %c0_i32 = arith.constant 0 : i32
    %c0_i32_0 = arith.constant 0 : i32
    %c0_i32_1 = arith.constant 0 : i32
    return %c0_i32, %c0_i32_0 : i32, i32
  }
  func.func @transform_7(%arg0: i32) -> (i32, i32) {
    %c0_i32 = arith.constant 0 : i32
    %c0_i32_0 = arith.constant 0 : i32
    return %arg0, %c0_i32 : i32, i32
  }
}

</mosaic_0001>

<bundles_post_ra>
// kernel: tpu_custom_call.1
= control target key start
LH: loop header
LB: loop body
LE: loop exit
PB: predicated region body
PF: predicated region fallthrough
CT: control target
= control target key end

     0   :  { %v1009_v38 = vmov 0   ;;  %s1209_s1 = inlined_call_operand.vmem [shape: bf16[512,4], index: 1, kind: input, shape index: {}]   ;;  %s1210_s0 = inlined_call_operand.vmem [shape: bf16[8,512], index: 0, kind: input, shape index: {}]   ;;  %s1211_s2 = inlined_call_operand.vmem [shape: f32[1,4], index: 2, kind: input, shape index: {}]   ;;  %s1212_s4 = inlined_call_operand.vmem [shape: f32[16,16], index: 4, kind: input, shape index: {}]   ;;  %s1213_s5 = inlined_call_operand.vmem [shape: f32[16,2], index: 5, kind: input, shape index: {}]   ;;  %s1214_s3 = inlined_call_operand.vmem [shape: f32[4,16], index: 3, kind: input, shape index: {}]   ;;  %s1215_s6 = inlined_call_operand.vmem [shape: f32[1,2], index: 6, kind: input, shape index: {}]   ;;  %s1216_s7 = inlined_call_operand.vmem [shape: f32[8,2], index: 7, kind: output, shape index: {}]  }
   0x1   :  { %v967_v0 = vld [vmem:[%s1209_s1 + $0x40] sm:$0xff]   ;;  %v971_v4 = vld [vmem:[%s1209_s1 + $0x48] sm:$0xff]   ;;  %v975_v8 = vld [vmem:[%s1209_s1 + $0x50] sm:$0xff]   ;;  %959 = vset.pattern.permute.xlu1 %v1009_v38  ;;  %961 = vset.pattern.permute.xlu0 %v1009_v38 }
   0x2   :  { %v968_v1 = vld [vmem:[%s1209_s1 + $0xc0] sm:$0xff]   ;;  %872 = vmatprep.subr.bf16.mxu0 %v967_v0  ;;  %v972_v5 = vld [vmem:[%s1209_s1 + $0xc8] sm:$0xff]   ;;  %v976_v9 = vld [vmem:[%s1209_s1 + $0xd0] sm:$0xff]  }
   0x3   :  { %v969_v2 = vld [vmem:[%s1209_s1] sm:$0xff]   ;;  %894 = vmatprep.subr.bf16.mxu1 %v968_v1  ;;  %v973_v6 = vld [vmem:[%s1209_s1 + $0x8] sm:$0xff]   ;;  %v977_v10 = vld [vmem:[%s1209_s1 + $0x10] sm:$0xff]  }
   0x4   :  { %v970_v3 = vld [vmem:[%s1209_s1 + $0x80] sm:$0xff]   ;;  %873 = vmatpush3.bf16.msra.mxu0 %v969_v2  ;;  %v974_v7 = vld [vmem:[%s1209_s1 + $0x88] sm:$0xff]   ;;  %v978_v11 = vld [vmem:[%s1209_s1 + $0x90] sm:$0xff]   ;;  %v1010_v2 = vmov 2102212464  }
   0x5   :  { %895 = vmatpush3.bf16.msra.mxu1 %v970_v3  ;;  %874 = vmatprep.subr.bf16.mxu0 %v971_v4  ;;  %v979_v12 = vld [vmem:[%s1209_s1 + $0x58] sm:$0xff]   ;;  %v983_v16 = vld [vmem:[%s1209_s1 + $0x60] sm:$0xff]   ;;  %v987_v20 = vld [vmem:[%s1209_s1 + $0x68] sm:$0xff]   ;;  %v1011_v4 = vmov 920167782  }
   0x6   :  { %896 = vmatprep.subr.bf16.mxu1 %v972_v5  ;;  %v980_v13 = vld [vmem:[%s1209_s1 + $0xd8] sm:$0xff]   ;;  %v984_v17 = vld [vmem:[%s1209_s1 + $0xe0] sm:$0xff]   ;;  %v988_v21 = vld [vmem:[%s1209_s1 + $0xe8] sm:$0xff]  }
   0x7   :  { %v981_v14 = vld [vmem:[%s1209_s1 + $0x18] sm:$0xff]   ;;  %v985_v18 = vld [vmem:[%s1209_s1 + $0x20] sm:$0xff]   ;;  %v989_v22 = vld [vmem:[%s1209_s1 + $0x28] sm:$0xff]  }
   0x8   :  { %875 = vmatpush3.bf16.msra.mxu0 %v973_v6  ;;  %v982_v15 = vld [vmem:[%s1209_s1 + $0x98] sm:$0xff]   ;;  %v986_v19 = vld [vmem:[%s1209_s1 + $0xa0] sm:$0xff]   ;;  %v990_v23 = vld [vmem:[%s1209_s1 + $0xa8] sm:$0xff]  }
   0x9   :  { %897 = vmatpush3.bf16.msra.mxu1 %v974_v7  ;;  %876 = vmatprep.subr.bf16.mxu0 %v975_v8  ;;  %v991_v24 = vld [vmem:[%s1209_s1 + $0x70] sm:$0xff]   ;;  %v995_v28 = vld [vmem:[%s1209_s1 + $0x78] sm:$0xff]   ;;  %v27_v32 = vld [vmem:[%s1210_s0] sm:$0xff]  ;;  %v1012_v8 = vmov 1326507024  }
   0xa   :  { %898 = vmatprep.subr.bf16.mxu1 %v976_v9  ;;  %v992_v25 = vld [vmem:[%s1209_s1 + $0xf0] sm:$0xff]   ;;  %v996_v29 = vld [vmem:[%s1209_s1 + $0xf8] sm:$0xff]   ;;  %v28_v33 = vld [vmem:[%s1210_s0 + $0x8] sm:$0xff]  ;;  %v825_v34 = vcombine.low %v27_v32, %v27_v32  ;;  %v826_v35 = vcombine.high %v27_v32, %v27_v32 }
   0xb   :  { %v993_v26 = vld [vmem:[%s1209_s1 + $0x30] sm:$0xff]   ;;  %v997_v30 = vld [vmem:[%s1209_s1 + $0x38] sm:$0xff]   ;;  %v827_v36 = vcombine.low %v28_v33, %v28_v33  ;;  %v828_v37 = vcombine.high %v28_v33, %v28_v33  ;;  %v824_v41 = vld [vmem:[%s1211_s2] ss:$0 sm:$0xff] }
   0xc   :  { %877 = vmatpush3.bf16.msra.mxu0 %v977_v10  ;;  %v994_v27 = vld [vmem:[%s1209_s1 + $0xb0] sm:$0xff]   ;;  %v998_v31 = vld [vmem:[%s1209_s1 + $0xb8] sm:$0xff]   ;;  %338 = vmatprep.mubr.bf16.mxu0 %v826_v35  ;;  %v1013_v10 = vmov 683565275  }
   0xd   :  { %899 = vmatpush3.bf16.msra.mxu1 %v978_v11  ;;  %878 = vmatprep.subr.bf16.mxu0 %v979_v12  ;;  %v1014_v12 = vmov 2475754826  }
   0xe   :  { %900 = vmatprep.subr.bf16.mxu1 %v980_v13  ;;  %378 = vmatprep.mubr.bf16.mxu1 %v828_v37 }
  0x10   :  { %879 = vmatpush3.bf16.msra.mxu0 %v981_v14 }
  0x11   :  { %901 = vmatpush3.bf16.msra.mxu1 %v982_v15  ;;  %880 = vmatprep.subr.bf16.mxu0 %v983_v16  ;;  %v1015_v15 = vmov 2131351028  }
  0x12   :  { %902 = vmatprep.subr.bf16.mxu1 %v984_v17 }
  0x14   :  { %881 = vmatpush3.bf16.msra.mxu0 %v985_v18 }
  0x15   :  { %903 = vmatpush3.bf16.msra.mxu1 %v986_v19  ;;  %882 = vmatprep.subr.bf16.mxu0 %v987_v20 }
  0x16   :  { %904 = vmatprep.subr.bf16.mxu1 %v988_v21 }
  0x18   :  { %883 = vmatpush3.bf16.msra.mxu0 %v989_v22 }
  0x19   :  { %905 = vmatpush3.bf16.msra.mxu1 %v990_v23  ;;  %884 = vmatprep.subr.bf16.mxu0 %v991_v24 }
  0x1a   :  { %906 = vmatprep.subr.bf16.mxu1 %v992_v25 }
  0x1c   :  { %885 = vmatpush3.bf16.msra.mxu0 %v993_v26 }
  0x1d   :  { %907 = vmatpush3.bf16.msra.mxu1 %v994_v27  ;;  %886 = vmatprep.subr.bf16.mxu0 %v995_v28 }
  0x1e   :  { %908 = vmatprep.subr.bf16.mxu1 %v996_v29 }
  0x20   :  { %887 = vmatpush3.bf16.msra.mxu0 %v997_v30 }
  0x21   :  { %909 = vmatpush3.bf16.msra.mxu1 %v998_v31 }
  0x23   :  { %339 = vmatmul.mubr.bf16.vlgmr.msra.gmra.mrb[0].mxu0 %v825_v34 }
  0x24   :  { %379 = vmatmul.mubr.bf16.vlgmr.msra.gmra.mrb[0].mxu1 %v827_v36 }
  0xf6   :  { %v888_v39 = vpop.f32.mrb[0].mxu0 }
  0xf7   :  { %v910_v40 = vpop.f32.mrb[0].mxu1  ;;  %v889_v42 = vpop.f32.mrb[1].mxu0 }
  0xf8   :  { %v911_v43 = vpop.f32.mrb[1].mxu1  ;;  %v890_v44 = vadd.f32 %v889_v42, %v888_v39  ;;  %v891_v46 = vpop.f32.mrb[2].mxu0 }
  0xf9   :  { %v912_v45 = vadd.f32 %v911_v43, %v910_v40  ;;  %v913_v47 = vpop.f32.mrb[2].mxu1  ;;  %v892_v48 = vpop.f32.mrb[3].mxu0 }
  0xfa   :  { %v914_v49 = vpop.f32.mrb[3].mxu1  ;;  %v341_v50 = vadd.f32 %v890_v44, %v824_v41 }
  0xfc   :  { %v381_v51 = vadd.f32 %v912_v45, %v341_v50 }
  0xfe   :  { %1003 = vtanh.f32 %v381_v51 }
 0x108   :  { %v1004_v52 = vpop.eup %1003 }
 0x109   :  { %v387_v53 = vmul.f32 0.7853982, %v1004_v52 }
 0x10b   :  { %v1167_v54 = vadd.f32 0.7853982, %v387_v53 }
 0x10d   :  { %v392_v55 = vand.u32 2139095040, %v1167_v54  ;;  %v389_v56 = vand.u32 2147483647, %v1167_v54  ;;  %vm391_vm7 = vcmp.lt.s32.totalorder %v1167_v54, 0  ;;  %vm481_vm15 = vweird.f32 %v1167_v54 }
 0x10f   :  { %v393_v57 = vshrl.u32 %v392_v55, 23  ;;  %v396_v59 = vand.u32 8388607, %v389_v56  ;;  %vm390_vm8 = vcmp.le.f32.partialorder %v389_v56, 0.7853982 }
 0x111   :  { %v861_v58 = vadd.s32 4294967169, %v393_v57  ;;  %v397_v62 = vor.u32 8388608, %v396_v59 }
 0x113   :  { %v399_v60 = vadd.s32 1, %v861_v58  ;;  %v437_v6 = vshll.u32 %v397_v62, 8 }
 0x115   :  { %vm400_vm0 = vcmp.gt.s32.totalorder %v399_v60, 0 }
 0x116   :  { %v401_v61 = vsel %vm400_vm0, %v399_v60, 0  ;;  %vm1020_vm0 = vmmov 0  }
 0x117   :  { %v403_v63 = vand.u32 31, %v401_v61  ;;  %v402_v0 = vshrl.u32 %v401_v61, 5 }
 0x119   :  { %v404_v1 = vsub.s32 32, %v403_v63  ;;  %v415_v3 = vshll.u32 %v1010_v2, %v403_v63  ;;  %v418_v5 = vshll.u32 %v1011_v4, %v403_v63  ;;  %v406_v11 = vshll.u32 %v1013_v10, %v403_v63 }
 0x11a   :  { %v409_v14 = vshll.u32 %v1014_v12, %v403_v63  ;;  %v412_v17 = vshll.u32 %v1015_v15, %v403_v63  ;;  %vm424_vm1 = vcmp.lt.s32.totalorder %v402_v0, 4  ;;  %vm421_vm2 = vcmp.lt.s32.totalorder %v402_v0, 1 }
 0x11b   :  { %v416_v7 = vshrl.u32 %v1011_v4, %v404_v1  ;;  %v419_v9 = vshrl.u32 %v1012_v8, %v404_v1  ;;  %v407_v13 = vshrl.u32 %v1014_v12, %v404_v1  ;;  %v410_v16 = vshrl.u32 %v1015_v15, %v404_v1 }
 0x11c   :  { %v413_v18 = vshrl.u32 %v1010_v2, %v404_v1  ;;  %v405_v22 = vshrl.u32 %v1013_v10, %v404_v1  ;;  %vm422_vm3 = vcmp.lt.s32.totalorder %v402_v0, 2  ;;  %vm423_vm4 = vcmp.lt.s32.totalorder %v402_v0, 3 }
 0x11d   :  { %v417_v19 = vor.u32 %v416_v7, %v415_v3  ;;  %v420_v20 = vor.u32 %v419_v9, %v418_v5  ;;  %v408_v21 = vor.u32 %v407_v13, %v406_v11  ;;  %v411_v23 = vor.u32 %v410_v16, %v409_v14 }
 0x11e   :  { %v414_v24 = vor.u32 %v413_v18, %v412_v17 }
 0x11f   :  { %v430_v25 = vsel %vm424_vm1, %v417_v19, 920167782  ;;  %v434_v26 = vsel %vm424_vm1, %v420_v20, 1326507024  ;;  %v429_v28 = vsel %vm421_vm2, %v408_v21, %v411_v23  ;;  %v425_v31 = vsel %vm421_vm2, %v405_v22, %v408_v21 }
 0x120   :  { %v426_v27 = vsel %vm424_vm1, %v414_v24, 2102212464  ;;  %v431_v29 = vsel %vm423_vm4, %v414_v24, %v430_v25  ;;  %v433_v30 = vsel %vm421_vm2, %v411_v23, %v414_v24  ;;  %v435_v34 = vsel %vm423_vm4, %v417_v19, %v434_v26 }
 0x121   :  { %v427_v32 = vsel %vm423_vm4, %v411_v23, %v426_v27  ;;  %v432_v33 = vsel %vm422_vm3, %v429_v28, %v431_v29  ;;  %v436_v35 = vsel %vm422_vm3, %v433_v30, %v435_v34  ;;  %v1016_v25 = vmov 1   ;;  %v659_v28 = vld [vmem:[%s1212_s4] sm:$0xff]  ;;  %v660_v29 = vld [vmem:[%s1212_s4 + $0x8] sm:$0xff] }
 0x122   :  { %v1173_v36 = vmul.u32.u64.low %v437_v6, %v432_v33  ;;  %v1174_v37 = vmul.u32.u64.high %v437_v6, %v432_v33, %v1173_v36  ;;  %v1176_v38 = vmul.u32.u64.low %v437_v6, %v436_v35  ;;  %v1177_v39 = vmul.u32.u64.high %v437_v6, %v436_v35, %v1176_v38  ;;  %v737_v33 = vld [vmem:[%s1213_s5 + $0x8] sm:$0xff] }
 0x123   :  { %v428_v40 = vsel %vm422_vm3, %v425_v31, %v427_v32  ;;  %v1017_v26 = vmov 2   ;;  %v1018_v27 = vmov 3   ;;  %v937_v30 = vpack.c.bf16 %v660_v29, %v659_v28  ;;  %v736_v32 = vld [vmem:[%s1213_s5] sm:$0xff] }
 0x124   :  { %v447_v41 = vadd.s32 1, %v1174_v37  ;;  %v444_v42 = vmul.u32 %v437_v6, %v428_v40  ;;  %vm446_vm5 = vc.u32 %v1177_v39, %v1173_v36  ;;  %v445_v55 = vadd.s32 %v1173_v36, %v1177_v39 }
 0x125   :  { %v1021_v31 = vmov 0.0   ;;  %v940_v34 = vpack.c.bf16 %v737_v33, %v736_v32  ;;  %v603_v35 = vlaneseq  ;;  %vm661_vm1 = vcmask 130048  }
 0x126   :  { %v448_v43 = vsel %vm446_vm5, %v447_v41, %v1174_v37  ;;  %926 = vmatprep.mubr.msk.f32.mxu0 %vm1020_vm0, %v1021_v31  ;;  %933 = vmatprep.mubr.msk.f32.mxu1 %vm1020_vm0, %v1021_v31  ;;  %v597_v41 = vld [vmem:[%s1214_s3] sm:$0xf]  ;;  %vm818_vm2 = vcmask 15360  }
 0x127   :  { %v449_v44 = vadd.s32 %v448_v43, %v444_v42  ;;  %v604_v36 = vshrl.u32 %v603_v35, 7 }
 0x129   :  { %v450_v45 = vadd.s32 536870912, %v449_v44  ;;  %v620_v38 = vsub.s32 1, %v604_v36  ;;  %v605_v39 = vsub.s32 0, %v604_v36  ;;  %v635_v43 = vsub.s32 2, %v604_v36 }
 0x12b   :  { %v451_v46 = vshrl.u32 %v450_v45, 30  ;;  %v621_v42 = vrot.slane %v597_v41, %v620_v38  ;;  %v606_v45 = vrot.slane %v597_v41, %v605_v39 }
 0x12d   :  { %v452_v47 = vshll.u32 %v451_v46, 30  ;;  %v475_v4 = vsub.s32 4, %v451_v46 }
 0x12f   :  { %v453_v48 = vsub.s32 %v449_v44, %v452_v47  ;;  %v476_v7 = vsel %vm391_vm7, %v475_v4, %v451_v46 }
 0x130   :  { %v478_v9 = vsel %vm390_vm8, 0, %v476_v7 }
 0x131   :  { %v455_v49 = vsub.s32 0, %v453_v48  ;;  %v585_v10 = vadd.s32 3, %v478_v9  ;;  %v482_v11 = vand.u32 3, %v478_v9 }
 0x133   :  { %v862_v50 = vmin.u32 %v455_v49, %v453_v48  ;;  %v586_v12 = vand.u32 3, %v585_v10  ;;  %vm487_vm9 = vcmp.eq.s32.totalorder %v482_v11, 2  ;;  %vm484_vm11 = vcmp.eq.s32.totalorder %v482_v11, 0 }
 0x134   :  { %vm483_vm13 = vcmp.lt.s32.totalorder %v482_v11, 2 }
 0x135   :  { %v457_v51 = vclz %v862_v50  ;;  %vm591_vm10 = vcmp.eq.s32.totalorder %v586_v12, 2  ;;  %vm588_vm12 = vcmp.eq.s32.totalorder %v586_v12, 0  ;;  %vm587_vm14 = vcmp.lt.s32.totalorder %v586_v12, 2 }
 0x137   :  { %v863_v52 = vadd.s32 4294967294, %v457_v51  ;;  %v650_v51 = vsub.s32 3, %v604_v36 }
 0x139   :  { %vm864_vm6 = vcmp.lt.s32.totalorder %v863_v52, 0 }
 0x13a   :  { %v460_v53 = vsel %vm864_vm6, 0, %v863_v52 }
 0x13b   :  { %v461_v57 = vsub.s32 32, %v460_v53  ;;  %v465_v58 = vsub.s32 4294967266, %v460_v53  ;;  %v462_v59 = vshll.u32 %v453_v48, %v460_v53  ;;  %v636_v48 = vrot.slane %v597_v41, %v635_v43 }
 0x13d   :  { %v463_v60 = vshrl.u32 %v445_v55, %v461_v57  ;;  %v466_v61 = vadd.s32 127, %v465_v58  ;;  %v651_v58 = vrot.slane %v597_v41, %v650_v51 }
 0x13f   :  { %v464_v62 = vor.u32 %v463_v60, %v462_v59  ;;  %v467_v63 = vshll.u32 %v466_v61, 23 }
 0x141   :  { %v468_v0 = vor.u32 4788187, %v467_v63  ;;  %v471_v2 = vcvt.s32.f32 %v464_v62 }
 0x143   :  { %v469_v1 = vand.u32 2147483647, %v468_v0 }
 0x145   :  { %v472_v3 = vmul.f32 %v471_v2, %v469_v1 }
 0x147   :  { %v473_v5 = vxor.u32 2147483648, %v472_v3 }
 0x149   :  { %v474_v6 = vsel %vm391_vm7, %v473_v5, %v472_v3 }
 0x14a   :  { %v477_v8 = vsel %vm390_vm8, %v1167_v54, %v474_v6  ;;  %v1019_v54 = vmov 0.0|0.0   ;;  %v870_v6 = vld [vmem:[%s1215_s6] ss:$0 sm:$0xff] }
 0x14b   :  { %1005 = vcosq.f32 %v477_v8  ;;  %936 = vmatprep.subr.bf16.mxu0 %v1019_v54  ;;  %939 = vmatprep.subr.bf16.mxu1 %v1019_v54 }
 0x14c   :  { %1007 = vsinq.f32 %v477_v8  ;;  %938 = vmatpush3.bf16.msra.mxu0 %v937_v30  ;;  %941 = vmatpush3.bf16.msra.mxu1 %v940_v34 }
 0x155   :  { %v1006_v13 = vpop.eup %1005 }
 0x156   :  { %v1008_v14 = vpop.eup %1007  ;;  %v488_v15 = vxor.u32 2147483648, %v1006_v13 }
 0x157   :  { %v485_v16 = vxor.u32 2147483648, %v1008_v14 }
 0x158   :  { %v489_v17 = vsel %vm487_vm9, %v488_v15, %v1008_v14  ;;  %v593_v56 = vsel %vm591_vm10, %v488_v15, %v1008_v14 }
 0x159   :  { %v486_v18 = vsel %vm484_vm11, %v1006_v13, %v485_v16  ;;  %v590_v19 = vsel %vm588_vm12, %v1006_v13, %v485_v16 }
 0x15a   :  { %v490_v20 = vsel %vm483_vm13, %v486_v18, %v489_v17  ;;  %v594_v21 = vsel %vm587_vm14, %v590_v19, %v593_v56 }
 0x15b   :  { %v491_v22 = vsel %vm481_vm15, nan, %v490_v20  ;;  %v595_v23 = vsel %vm481_vm15, nan, %v594_v21 }
 0x15c   :  { %610 = vperm.xlu1 %959, %v491_v22   ;;  %v596_v24 = vsub.f32 %v595_v23, %v491_v22 }
 0x15e   :  { %600 = vperm.xlu0 %961, %v596_v24  }
 0x160   :  { %960 = vset.pattern.permute.xlu1 %v1016_v25 }
 0x161   :  { %624 = vperm.xlu1 %960, %v491_v22  }
 0x162   :  { %962 = vset.pattern.permute.xlu0 %v1016_v25 }
 0x163   :  { %615 = vperm.xlu0 %962, %v596_v24  }
 0x165   :  { %963 = vset.pattern.permute.xlu1 %v1017_v26 }
 0x166   :  { %630 = vperm.xlu1 %963, %v596_v24  }
 0x167   :  { %964 = vset.pattern.permute.xlu0 %v1017_v26 }
 0x168   :  { %639 = vperm.xlu0 %964, %v491_v22  }
 0x16a   :  { %965 = vset.pattern.permute.xlu1 %v1018_v27 }
 0x16b   :  { %645 = vperm.xlu1 %965, %v596_v24  }
 0x16c   :  { %966 = vset.pattern.permute.xlu0 %v1018_v27 }
 0x16f   :  { %654 = vperm.xlu1 %965, %v491_v22  }
 0x1db   :  { %v611_v37 = vpop.permute.xlu1 %610 }
 0x1dd   :  { %v601_v40 = vpop.permute.xlu0 %600 }
 0x1de   :  { %v607_v49 = vmul.f32 %v606_v45, %v601_v40 }
 0x1e0   :  { %v625_v44 = vpop.permute.xlu1 %624  ;;  %v613_v57 = vadd.f32 %v611_v37, %v607_v49 }
 0x1e2   :  { %v616_v46 = vpop.permute.xlu0 %615 }
 0x1e3   :  { %v622_v47 = vmul.f32 %v621_v42, %v616_v46 }
 0x1e5   :  { %v631_v50 = vpop.permute.xlu1 %630  ;;  %v627_v52 = vadd.f32 %v625_v44, %v622_v47 }
 0x1e6   :  { %v637_v53 = vmul.f32 %v636_v48, %v631_v50 }
 0x1e7   :  { %v640_v55 = vpop.permute.xlu0 %639  ;;  %v628_v60 = vmul.f32 %v627_v52, %v613_v57 }
 0x1e8   :  { %v642_v61 = vadd.f32 %v640_v55, %v637_v53 }
 0x1ea   :  { %v646_v59 = vpop.permute.xlu1 %645  ;;  %v643_v0 = vmul.f32 %v642_v61, %v628_v60 }
 0x1eb   :  { %v652_v62 = vmul.f32 %v651_v58, %v646_v59 }
 0x1ee   :  { %v655_v63 = vpop.permute.xlu1 %654 }
 0x1ef   :  { %v657_v1 = vadd.f32 %v655_v63, %v652_v62 }
 0x1f1   :  { %v658_v2 = vmul.f32 %v657_v1, %v643_v0 }
 0x1f3   :  { %927 = vmatmul.mubr.msk.f32.vlgmr.msra.gmra.mrb[4].mxu0 %vm661_vm1, %v658_v2 }
 0x2c6   :  { %v731_v3 = vpop.f32.mrb[4].mxu0 }
 0x2c7   :  { %v735_v4 = vmul.f32 %v731_v3, %v731_v3  ;;  %v928_v5 = vpop.f32.mrb[5].mxu0 }
 0x2c9   :  { %934 = vmatmul.mubr.msk.f32.vlgmr.msra.gmra.mrb[4].mxu1 %vm661_vm1, %v735_v4 }
 0x39c   :  { %v814_v7 = vpop.f32.mrb[4].mxu1 }
 0x39d   :  { %v815_v8 = vadd.f32 %v870_v6, %v814_v7  ;;  %v935_v9 = vpop.f32.mrb[5].mxu1 }
 0x39f   :  { %819 = vst.msk [vmem:[%s1216_s7] sm:$0xff] %vm818_vm2, %v815_v8 }

</bundles_post_ra>
